<compile_context>
chip_gen: v6e
topology: v6e:2x2x1
jax: 0.10.0
libtpu: 0.0.40
codegen_flags: <defaults>
</compile_context>

<pallas_src>
import functools
import math

import jax
import jax.numpy as jnp
from jax import lax
from jax.experimental import pallas as pl
from jax.experimental.pallas import tpu as pltpu

f32 = jnp.float32


# ---------------------------------------------------------------------------
# Kernel 1: fused Q/K/V in-projection, written head-major (B, H, S, Dh).
# Runs once per token tile (no per-q-tile recomputation).
# ---------------------------------------------------------------------------
def qkv_proj_kernel(xq_ref, xk_ref, xv_ref,
                    wq_ref, bq_ref, wk_ref, bk_ref, wv_ref, bv_ref,
                    q_out, k_out, v_out):
    H = wq_ref.shape[0]
    dt = q_out.dtype

    def _proj(x_ref, w_ref, b_ref, o_ref):
        x = x_ref[0]                                    # (ts, E), native dtype
        xb = jnp.broadcast_to(x, (H,) + x.shape)        # (H, ts, E)
        # TODO(synk): a fused lane-dense (ts,E)@(E,E) matmul + head-major
        # relayout would use all 256 MXU columns on v6e/v7x; kept head-batched
        # einsum for robust Mosaic lowering at arbitrary Dh.
        y = jnp.einsum('hse,hed->hsd', xb, w_ref[...],
                       preferred_element_type=f32)      # f32 accumulation
        o_ref[0] = (y + b_ref[...].astype(f32)).astype(dt)

    _proj(xq_ref, wq_ref, bq_ref, q_out)   # wq/bq already scaled by 1/sqrt(Dh)
    _proj(xk_ref, wk_ref, bk_ref, k_out)
    _proj(xv_ref, wv_ref, bv_ref, v_out)


# ---------------------------------------------------------------------------
# Kernel 2: flash attention (online softmax over KV tiles) + O-projection.
# ---------------------------------------------------------------------------
def flash_attention_kernel(q_ref, k_ref, v_ref, wo_ref, bo_ref, out_ref,
                           m_sc, l_sc, acc_sc, *, seq_len, kv_tile, masked):
    dt = q_ref.dtype
    H = q_ref.shape[1]
    ki = pl.program_id(2)
    n_kv = pl.num_programs(2)

    @pl.when(ki == 0)
    def _init():
        m_sc[...] = jnp.full(m_sc.shape, -jnp.inf, dtype=m_sc.dtype)
        l_sc[...] = jnp.zeros(l_sc.shape, dtype=l_sc.dtype)
        acc_sc[...] = jnp.zeros(acc_sc.shape, dtype=acc_sc.dtype)

    qh = q_ref[0]                                       # (H, tq, Dh)
    kh = k_ref[0]                                       # (H, tkv, Dh)
    vh = v_ref[0]                                       # (H, tkv, Dh)

    s = jnp.einsum('hqd,hkd->hqk', qh, kh, preferred_element_type=f32)
    if masked:                                          # padded keys -> -1e30
        col = ki * kv_tile + lax.broadcasted_iota(jnp.int32, (1, 1, kv_tile), 2)
        s = jnp.where(col < seq_len, s, -1e30)

    m_prev = m_sc[...]
    m_new = jnp.maximum(m_prev, s.max(axis=-1, keepdims=True))
    alpha = jnp.exp(m_prev - m_new)
    p = jnp.exp(s - m_new)
    l_sc[...] = alpha * l_sc[...] + p.sum(axis=-1, keepdims=True)
    acc_sc[...] = alpha * acc_sc[...] + jnp.einsum(
        'hqk,hkd->hqd', p.astype(dt), vh, preferred_element_type=f32)
    m_sc[...] = m_new

    @pl.when(ki == n_kv - 1)
    def _finalize():
        # exact reciprocal: runs once per q-tile, essentially free
        ctx = (acc_sc[...] / l_sc[...]).astype(dt)      # (H, tq, Dh)
        # Per-head (tq,Dh)@(Dh,E) dots accumulated immediately (only one f32
        # (tq,E) slab live).  A single fused 'hqd,hde->qe' double contraction
        # is not expressible as one Mosaic dot_general.
        acc = bo_ref[...].astype(f32)                   # (1, E), broadcasts
        for h in range(H):
            acc = acc + jnp.dot(ctx[h], wo_ref[h], preferred_element_type=f32)
        out_ref[0] = acc.astype(out_ref.dtype)


# ---------------------------------------------------------------------------
# Kernel 3: residual + LayerNorm1 + FFN(ReLU) + residual + LayerNorm2.
# ---------------------------------------------------------------------------
def ffn_ln_kernel(x_ref, attn_ref, g1_ref, beta1_ref, w1_ref, b1_ref,
                  w2_ref, b2_ref, g2_ref, beta2_ref, out_ref, *, eps):
    dt = x_ref.dtype
    x = x_ref[0].astype(f32)
    attn = attn_ref[0].astype(f32)

    # TODO(synk): nn.Dropout omitted (inference/eval semantics => identity)
    h1 = x + attn
    mu1 = jnp.mean(h1, axis=-1, keepdims=True)
    var1 = jnp.mean(jnp.square(h1 - mu1), axis=-1, keepdims=True)
    h1 = (h1 - mu1) * lax.rsqrt(var1 + eps) * g1_ref[...].astype(f32) \
        + beta1_ref[...].astype(f32)

    ff = jnp.dot(h1.astype(dt), w1_ref[...], preferred_element_type=f32) \
        + b1_ref[...].astype(f32)
    ff = jnp.maximum(ff, 0.0)
    ff = jnp.dot(ff.astype(dt), w2_ref[...], preferred_element_type=f32) \
        + b2_ref[...].astype(f32)

    h2 = h1 + ff
    mu2 = jnp.mean(h2, axis=-1, keepdims=True)
    var2 = jnp.mean(jnp.square(h2 - mu2), axis=-1, keepdims=True)
    out = (h2 - mu2) * lax.rsqrt(var2 + eps) * g2_ref[...].astype(f32) \
        + beta2_ref[...].astype(f32)
    out_ref[0] = out.astype(out_ref.dtype)


# ---------------------------------------------------------------------------
# Host-side wrapper.
# ---------------------------------------------------------------------------
def _round_up(x, m):
    return ((x + m - 1) // m) * m


def _pick_config():
    """Per-generation (tile, vmem_limit): 256-wide tiles + large budget on v6e
    (128 MiB VMEM, 256-wide MXU), 128 on v5e (128-wide MXU), conservative
    budget for v7x (64 MiB VMEM) / unknown."""
    tile, vmem = 128, 48 * 1024 * 1024
    try:
        kind = jax.devices()[0].device_kind.lower()
        if "v6" in kind:
            tile, vmem = 256, 96 * 1024 * 1024
        elif "v5" in kind:
            tile, vmem = 128, 96 * 1024 * 1024
    except Exception:
        pass
    return tile, vmem


def transformer_encoder_layer(src_q, src_k, src_v, params, num_heads, eps=1e-5,
                              q_tile=None, kv_tile=None, compute_dtype=None):
    B, S, E = src_q.shape
    H = num_heads
    Dh = E // H
    F = params["w1"].shape[1]
    out_dtype = src_q.dtype

    auto_tile, vmem_limit = _pick_config()
    q_tile = q_tile or auto_tile
    kv_tile = kv_tile or auto_tile

    # Optionally run matmuls in bf16 on v6e/v7x (stats/accumulators stay f32).
    dt = jnp.dtype(compute_dtype) if compute_dtype is not None else src_q.dtype
    cast = lambda a: a.astype(dt)

    # --- pad the sequence so tiles always divide it (never S-wide fallback) ---
    if S <= min(q_tile, kv_tile):
        S_pad = _round_up(S, 8)
        tq = tkv = S_pad
    else:
        S_pad = _round_up(S, math.lcm(q_tile, kv_tile))
        tq, tkv = q_tile, kv_tile
    masked = S_pad != S

    if masked:
        pad = ((0, 0), (0, S_pad - S), (0, 0))
        src_q_p = jnp.pad(src_q, pad)
        src_k_p = jnp.pad(src_k, pad)
        src_v_p = jnp.pad(src_v, pad)
    else:
        src_q_p, src_k_p, src_v_p = src_q, src_k, src_v
    src_q_p, src_k_p, src_v_p = cast(src_q_p), cast(src_k_p), cast(src_v_p)

    # --- head-major weights; wq/bq pre-scaled by 1/sqrt(Dh) host-side ---
    scale = 1.0 / math.sqrt(Dh)
    wq_h = cast((params["wq"] * scale).reshape(E, H, Dh).transpose(1, 0, 2))
    bq_h = cast((params["bq"] * scale).reshape(H, 1, Dh))
    wk_h = cast(params["wk"].reshape(E, H, Dh).transpose(1, 0, 2))
    bk_h = cast(params["bk"].reshape(H, 1, Dh))
    wv_h = cast(params["wv"].reshape(E, H, Dh).transpose(1, 0, 2))
    bv_h = cast(params["bv"].reshape(H, 1, Dh))
    wo_h = cast(params["wo"].reshape(H, Dh, E))
    bo = cast(params["bo"].reshape(1, E))
    g1 = cast(params["g1"].reshape(1, E))
    beta1 = cast(params["beta1"].reshape(1, E))
    g2 = cast(params["g2"].reshape(1, E))
    beta2 = cast(params["beta2"].reshape(1, E))
    w1 = cast(params["w1"])
    b1 = cast(params["b1"].reshape(1, F))
    w2 = cast(params["w2"])
    b2 = cast(params["b2"].reshape(1, E))

    isz = jnp.dtype(dt).itemsize
    n_q = S_pad // tq
    n_kv = S_pad // tkv

    def _const(shape):
        # Constant block index across the whole grid -> DMA'd once; single-buffer
        # so resident weights don't burn 2x VMEM.
        nd = len(shape)
        return pl.BlockSpec(shape, lambda *_: (0,) * nd,
                            pipeline_mode=pl.Buffered(1))

    def _cparams(sem):
        return pltpu.CompilerParams(dimension_semantics=sem,
                                    vmem_limit_bytes=vmem_limit)

    # ------------------- 1) QKV in-projection (once per token) -------------------
    proj_cost = pl.CostEstimate(
        flops=int(2 * 3 * B * S_pad * E * E),
        transcendentals=0,
        bytes_accessed=int(isz * (6 * B * S_pad * E + 3 * E * E + 3 * E)))
    q_h, k_h, v_h = pl.pallas_call(
        qkv_proj_kernel,
        out_shape=(jax.ShapeDtypeStruct((B, H, S_pad, Dh), dt),
                   jax.ShapeDtypeStruct((B, H, S_pad, Dh), dt),
                   jax.ShapeDtypeStruct((B, H, S_pad, Dh), dt)),
        grid_spec=pltpu.PrefetchScalarGridSpec(
            num_scalar_prefetch=0,
            grid=(B, n_q),
            in_specs=[
                pl.BlockSpec((1, tq, E), lambda b, si: (b, si, 0)),
                pl.BlockSpec((1, tq, E), lambda b, si: (b, si, 0)),
                pl.BlockSpec((1, tq, E), lambda b, si: (b, si, 0)),
                _const((H, E, Dh)), _const((H, 1, Dh)),
                _const((H, E, Dh)), _const((H, 1, Dh)),
                _const((H, E, Dh)), _const((H, 1, Dh)),
            ],
            out_specs=[
                pl.BlockSpec((1, H, tq, Dh), lambda b, si: (b, 0, si, 0)),
                pl.BlockSpec((1, H, tq, Dh), lambda b, si: (b, 0, si, 0)),
                pl.BlockSpec((1, H, tq, Dh), lambda b, si: (b, 0, si, 0)),
            ]),
        compiler_params=_cparams(("parallel", "parallel")),
        cost_estimate=proj_cost,
    )(src_q_p, src_k_p, src_v_p, wq_h, bq_h, wk_h, bk_h, wv_h, bv_h)

    # ------------------- 2) flash attention + O-projection -----------------------
    attn_cost = pl.CostEstimate(
        flops=int(4 * B * H * S_pad * S_pad * Dh + 2 * B * S_pad * E * E),
        transcendentals=int(B * H * S_pad * S_pad),
        bytes_accessed=int(isz * (B * S_pad * E * (2 + 2 * n_q) + E * E + E)))
    attn_out = pl.pallas_call(
        functools.partial(flash_attention_kernel,
                          seq_len=S, kv_tile=tkv, masked=masked),
        out_shape=jax.ShapeDtypeStruct((B, S_pad, E), dt),
        grid_spec=pltpu.PrefetchScalarGridSpec(
            num_scalar_prefetch=0,
            grid=(B, n_q, n_kv),
            in_specs=[
                pl.BlockSpec((1, H, tq, Dh), lambda b, qi, ki: (b, 0, qi, 0)),
                pl.BlockSpec((1, H, tkv, Dh), lambda b, qi, ki: (b, 0, ki, 0)),
                pl.BlockSpec((1, H, tkv, Dh), lambda b, qi, ki: (b, 0, ki, 0)),
                _const((H, Dh, E)), _const((1, E)),
            ],
            out_specs=pl.BlockSpec((1, tq, E), lambda b, qi, ki: (b, qi, 0)),
            scratch_shapes=[
                pltpu.VMEM((H, tq, 1), jnp.float32),    # running max
                pltpu.VMEM((H, tq, 1), jnp.float32),    # running sum
                pltpu.VMEM((H, tq, Dh), jnp.float32),   # running weighted-V acc
            ]),
        compiler_params=_cparams(("parallel", "parallel", "arbitrary")),
        cost_estimate=attn_cost,
    )(q_h, k_h, v_h, wo_h, bo)

    # ------------------- 3) residual/LN1 + FFN + residual/LN2 --------------------
    ffn_cost = pl.CostEstimate(
        flops=int(4 * B * S_pad * E * F),
        transcendentals=int(2 * B * S_pad),
        bytes_accessed=int(isz * (3 * B * S_pad * E + 2 * E * F + F + 5 * E)))
    out = pl.pallas_call(
        functools.partial(ffn_ln_kernel, eps=eps),
        out_shape=jax.ShapeDtypeStruct((B, S_pad, E), out_dtype),
        grid_spec=pltpu.PrefetchScalarGridSpec(
            num_scalar_prefetch=0,
            grid=(B, n_q),
            in_specs=[
                pl.BlockSpec((1, tq, E), lambda b, si: (b, si, 0)),
                pl.BlockSpec((1, tq, E), lambda b, si: (b, si, 0)),
                _const((1, E)), _const((1, E)),
                _const((E, F)), _const((1, F)),
                _const((F, E)), _const((1, E)),
                _const((1, E)), _const((1, E)),
            ],
            out_specs=pl.BlockSpec((1, tq, E), lambda b, si: (b, si, 0))),
        compiler_params=_cparams(("parallel", "parallel")),
        cost_estimate=ffn_cost,
    )(src_q_p, attn_out, g1, beta1, w1, b1, w2, b2, g2, beta2)

    if masked:
        out = out[:, :S, :]
    return out


# ---------------------------------------------------------------------------
# Pure-JAX reference for correctness check.
# ---------------------------------------------------------------------------
def reference(src_q, src_k, src_v, p, num_heads, eps=1e-5):
    B, S, E = src_q.shape
    Dh = E // num_heads
    q = src_q @ p["wq"] + p["bq"]
    k = src_k @ p["wk"] + p["bk"]
    v = src_v @ p["wv"] + p["bv"]
    split = lambda x: x.reshape(B, S, num_heads, Dh).transpose(0, 2, 1, 3)
    qh, kh, vh = split(q), split(k), split(v)
    s = jnp.einsum("bhqd,bhkd->bhqk", qh, kh) / math.sqrt(Dh)
    att = jax.nn.softmax(s, axis=-1)
    o = jnp.einsum("bhqk,bhkd->bhqd", att, vh).transpose(0, 2, 1, 3).reshape(B, S, E)
    o = o @ p["wo"] + p["bo"]

    def ln(x, g, b):
        mu = x.mean(-1, keepdims=True)
        var = ((x - mu) ** 2).mean(-1, keepdims=True)
        return (x - mu) / jnp.sqrt(var + eps) * g + b

    h1 = ln(src_q + o, p["g1"], p["beta1"])
    ff = jnp.maximum(h1 @ p["w1"] + p["b1"], 0.0) @ p["w2"] + p["b2"]
    return ln(h1 + ff, p["g2"], p["beta2"])


if __name__ == "__main__":
    B, S = 2, 8
    dim_model, num_heads, dim_feedforward = 32, 4, 64

    key = jax.random.PRNGKey(0)
    ks = jax.random.split(key, 16)
    n = lambda k, shape, scale=0.1: (scale * jax.random.normal(k, shape)).astype(jnp.float32)

    params = {
        "wq": n(ks[0], (dim_model, dim_model)),   "bq": n(ks[1], (dim_model,)),
        "wk": n(ks[2], (dim_model, dim_model)),   "bk": n(ks[3], (dim_model,)),
        "wv": n(ks[4], (dim_model, dim_model)),   "bv": n(ks[5], (dim_model,)),
        "wo": n(ks[6], (dim_model, dim_model)),   "bo": n(ks[7], (dim_model,)),
        "g1": jnp.ones((dim_model,), jnp.float32),
        "beta1": jnp.zeros((dim_model,), jnp.float32),
        "w1": n(ks[8], (dim_model, dim_feedforward)),
        "b1": n(ks[9], (dim_feedforward,)),
        "w2": n(ks[10], (dim_feedforward, dim_model)),
        "b2": n(ks[11], (dim_model,)),
        "g2": jnp.ones((dim_model,), jnp.float32),
        "beta2": jnp.zeros((dim_model,), jnp.float32),
    }

    src_q = jax.random.normal(ks[12], (B, S, dim_model), jnp.float32)
    src_k = jax.random.normal(ks[13], (B, S, dim_model), jnp.float32)
    src_v = jax.random.normal(ks[14], (B, S, dim_model), jnp.float32)

    out = transformer_encoder_layer(src_q, src_k, src_v, params, num_heads)
    out = jax.block_until_ready(out)

    ref = reference(src_q, src_k, src_v, params, num_heads)
    assert out.shape == (B, S, dim_model)
    assert jnp.allclose(out, ref, atol=2e-2, rtol=2e-2), float(jnp.max(jnp.abs(out - ref)))

    print("KERNEL_OK")
</pallas_src>

<mosaic_0001>
module attributes {stable_mosaic.version = 11 : i64} {
  func.func @qkv_proj_kernel(%arg0: i32, %arg1: i32, %arg2: memref<1x8x32xf32, #tpu.memory_space<vmem>>, %arg3: memref<1x8x32xf32, #tpu.memory_space<vmem>>, %arg4: memref<1x8x32xf32, #tpu.memory_space<vmem>>, %arg5: memref<4x32x8xf32, #tpu.memory_space<vmem>>, %arg6: memref<4x1x8xf32, #tpu.memory_space<vmem>>, %arg7: memref<4x32x8xf32, #tpu.memory_space<vmem>>, %arg8: memref<4x1x8xf32, #tpu.memory_space<vmem>>, %arg9: memref<4x32x8xf32, #tpu.memory_space<vmem>>, %arg10: memref<4x1x8xf32, #tpu.memory_space<vmem>>, %arg11: memref<1x4x8x8xf32, #tpu.memory_space<vmem>>, %arg12: memref<1x4x8x8xf32, #tpu.memory_space<vmem>>, %arg13: memref<1x4x8x8xf32, #tpu.memory_space<vmem>>) attributes {dimension_semantics = [#tpu.dimension_semantics<parallel>, #tpu.dimension_semantics<parallel>], iteration_bounds = array<i64: 2, 1>, scalar_prefetch = 0 : i64, scratch_operands = 0 : i64, tpu.core_type = #tpu.core_type<tc>, window_params = [{transform_indices = @transform_0, window_bounds = array<i64: 1, 8, 32>}, {transform_indices = @transform_1, window_bounds = array<i64: 1, 8, 32>}, {transform_indices = @transform_2, window_bounds = array<i64: 1, 8, 32>}, {pipeline_mode = #tpu.pipeline_mode<synchronous>, transform_indices = @transform_3, window_bounds = array<i64: 4, 32, 8>}, {pipeline_mode = #tpu.pipeline_mode<synchronous>, transform_indices = @transform_4, window_bounds = array<i64: 4, 1, 8>}, {pipeline_mode = #tpu.pipeline_mode<synchronous>, transform_indices = @transform_5, window_bounds = array<i64: 4, 32, 8>}, {pipeline_mode = #tpu.pipeline_mode<synchronous>, transform_indices = @transform_6, window_bounds = array<i64: 4, 1, 8>}, {pipeline_mode = #tpu.pipeline_mode<synchronous>, transform_indices = @transform_7, window_bounds = array<i64: 4, 32, 8>}, {pipeline_mode = #tpu.pipeline_mode<synchronous>, transform_indices = @transform_8, window_bounds = array<i64: 4, 1, 8>}, {transform_indices = @transform_9, window_bounds = array<i64: 1, 4, 8, 8>}, {transform_indices = @transform_10, window_bounds = array<i64: 1, 4, 8, 8>}, {transform_indices = @transform_11, window_bounds = array<i64: 1, 4, 8, 8>}]} {
    %c0 = arith.constant 0 : index
    %c0_0 = arith.constant 0 : index
    %c0_1 = arith.constant 0 : index
    %0 = vector.load %arg2[%c0, %c0_0, %c0_1] : memref<1x8x32xf32, #tpu.memory_space<vmem>>, vector<1x8x32xf32>
    %1 = vector.shape_cast %0 : vector<1x8x32xf32> to vector<8x32xf32>
    %2 = vector.shape_cast %1 : vector<8x32xf32> to vector<1x8x32xf32>
    %3 = vector.broadcast %2 : vector<1x8x32xf32> to vector<4x8x32xf32>
    %c0_2 = arith.constant 0 : index
    %c0_3 = arith.constant 0 : index
    %c0_4 = arith.constant 0 : index
    %4 = vector.load %arg5[%c0_2, %c0_3, %c0_4] : memref<4x32x8xf32, #tpu.memory_space<vmem>>, vector<4x32x8xf32>
    "tpu.trace_start"() <{level = 10 : i32, message = "hse,hed->hsd"}> : () -> ()
    %cst = arith.constant dense<0.000000e+00> : vector<4x8x8xf32>
    %5 = tpu.matmul %3, %4, %cst {dimension_numbers = #tpu.dot_dimension_numbers<[2], [1], [1], [2], [0, 0, 0, 1, 1, 2], [0], [0]>} : vector<4x8x32xf32>, vector<4x32x8xf32>, vector<4x8x8xf32> -> vector<4x8x8xf32>
    "tpu.trace_stop"() : () -> ()
    %c0_5 = arith.constant 0 : index
    %c0_6 = arith.constant 0 : index
    %c0_7 = arith.constant 0 : index
    %6 = vector.load %arg6[%c0_5, %c0_6, %c0_7] : memref<4x1x8xf32, #tpu.memory_space<vmem>>, vector<4x1x8xf32>
    %7 = vector.broadcast %6 : vector<4x1x8xf32> to vector<4x8x8xf32>
    %8 = arith.addf %5, %7 : vector<4x8x8xf32>
    %c0_8 = arith.constant 0 : index
    %c0_9 = arith.constant 0 : index
    %c0_10 = arith.constant 0 : index
    %c0_11 = arith.constant 0 : index
    %9 = vector.load %arg11[%c0_8, %c0_9, %c0_10, %c0_11] : memref<1x4x8x8xf32, #tpu.memory_space<vmem>>, vector<1x4x8x8xf32>
    %10 = vector.shape_cast %9 : vector<1x4x8x8xf32> to vector<4x8x8xf32>
    %11 = vector.shape_cast %8 : vector<4x8x8xf32> to vector<1x4x8x8xf32>
    tpu.vector_store %arg11[%c0_8, %c0_9, %c0_10, %c0_11], %11 {strides = array<i32>} : memref<1x4x8x8xf32, #tpu.memory_space<vmem>>, vector<1x4x8x8xf32>,
    %c0_12 = arith.constant 0 : index
    %c0_13 = arith.constant 0 : index
    %c0_14 = arith.constant 0 : index
    %12 = vector.load %arg3[%c0_12, %c0_13, %c0_14] : memref<1x8x32xf32, #tpu.memory_space<vmem>>, vector<1x8x32xf32>
    %13 = vector.shape_cast %12 : vector<1x8x32xf32> to vector<8x32xf32>
    %14 = vector.shape_cast %13 : vector<8x32xf32> to vector<1x8x32xf32>
    %15 = vector.broadcast %14 : vector<1x8x32xf32> to vector<4x8x32xf32>
    %c0_15 = arith.constant 0 : index
    %c0_16 = arith.constant 0 : index
    %c0_17 = arith.constant 0 : index
    %16 = vector.load %arg7[%c0_15, %c0_16, %c0_17] : memref<4x32x8xf32, #tpu.memory_space<vmem>>, vector<4x32x8xf32>
    "tpu.trace_start"() <{level = 10 : i32, message = "hse,hed->hsd"}> : () -> ()
    %cst_18 = arith.constant dense<0.000000e+00> : vector<4x8x8xf32>
    %17 = tpu.matmul %15, %16, %cst_18 {dimension_numbers = #tpu.dot_dimension_numbers<[2], [1], [1], [2], [0, 0, 0, 1, 1, 2], [0], [0]>} : vector<4x8x32xf32>, vector<4x32x8xf32>, vector<4x8x8xf32> -> vector<4x8x8xf32>
    "tpu.trace_stop"() : () -> ()
    %c0_19 = arith.constant 0 : index
    %c0_20 = arith.constant 0 : index
    %c0_21 = arith.constant 0 : index
    %18 = vector.load %arg8[%c0_19, %c0_20, %c0_21] : memref<4x1x8xf32, #tpu.memory_space<vmem>>, vector<4x1x8xf32>
    %19 = vector.broadcast %18 : vector<4x1x8xf32> to vector<4x8x8xf32>
    %20 = arith.addf %17, %19 : vector<4x8x8xf32>
    %c0_22 = arith.constant 0 : index
    %c0_23 = arith.constant 0 : index
    %c0_24 = arith.constant 0 : index
    %c0_25 = arith.constant 0 : index
    %21 = vector.load %arg12[%c0_22, %c0_23, %c0_24, %c0_25] : memref<1x4x8x8xf32, #tpu.memory_space<vmem>>, vector<1x4x8x8xf32>
    %22 = vector.shape_cast %21 : vector<1x4x8x8xf32> to vector<4x8x8xf32>
    %23 = vector.shape_cast %20 : vector<4x8x8xf32> to vector<1x4x8x8xf32>
    tpu.vector_store %arg12[%c0_22, %c0_23, %c0_24, %c0_25], %23 {strides = array<i32>} : memref<1x4x8x8xf32, #tpu.memory_space<vmem>>, vector<1x4x8x8xf32>,
    %c0_26 = arith.constant 0 : index
    %c0_27 = arith.constant 0 : index
    %c0_28 = arith.constant 0 : index
    %24 = vector.load %arg4[%c0_26, %c0_27, %c0_28] : memref<1x8x32xf32, #tpu.memory_space<vmem>>, vector<1x8x32xf32>
    %25 = vector.shape_cast %24 : vector<1x8x32xf32> to vector<8x32xf32>
    %26 = vector.shape_cast %25 : vector<8x32xf32> to vector<1x8x32xf32>
    %27 = vector.broadcast %26 : vector<1x8x32xf32> to vector<4x8x32xf32>
    %c0_29 = arith.constant 0 : index
    %c0_30 = arith.constant 0 : index
    %c0_31 = arith.constant 0 : index
    %28 = vector.load %arg9[%c0_29, %c0_30, %c0_31] : memref<4x32x8xf32, #tpu.memory_space<vmem>>, vector<4x32x8xf32>
    "tpu.trace_start"() <{level = 10 : i32, message = "hse,hed->hsd"}> : () -> ()
    %cst_32 = arith.constant dense<0.000000e+00> : vector<4x8x8xf32>
    %29 = tpu.matmul %27, %28, %cst_32 {dimension_numbers = #tpu.dot_dimension_numbers<[2], [1], [1], [2], [0, 0, 0, 1, 1, 2], [0], [0]>} : vector<4x8x32xf32>, vector<4x32x8xf32>, vector<4x8x8xf32> -> vector<4x8x8xf32>
    "tpu.trace_stop"() : () -> ()
    %c0_33 = arith.constant 0 : index
    %c0_34 = arith.constant 0 : index
    %c0_35 = arith.constant 0 : index
    %30 = vector.load %arg10[%c0_33, %c0_34, %c0_35] : memref<4x1x8xf32, #tpu.memory_space<vmem>>, vector<4x1x8xf32>
    %31 = vector.broadcast %30 : vector<4x1x8xf32> to vector<4x8x8xf32>
    %32 = arith.addf %29, %31 : vector<4x8x8xf32>
    %c0_36 = arith.constant 0 : index
    %c0_37 = arith.constant 0 : index
    %c0_38 = arith.constant 0 : index
    %c0_39 = arith.constant 0 : index
    %33 = vector.load %arg13[%c0_36, %c0_37, %c0_38, %c0_39] : memref<1x4x8x8xf32, #tpu.memory_space<vmem>>, vector<1x4x8x8xf32>
    %34 = vector.shape_cast %33 : vector<1x4x8x8xf32> to vector<4x8x8xf32>
    %35 = vector.shape_cast %32 : vector<4x8x8xf32> to vector<1x4x8x8xf32>
    tpu.vector_store %arg13[%c0_36, %c0_37, %c0_38, %c0_39], %35 {strides = array<i32>} : memref<1x4x8x8xf32, #tpu.memory_space<vmem>>, vector<1x4x8x8xf32>,
    return
  }
  func.func @transform_0(%arg0: i32, %arg1: i32) -> (i32, i32, i32) {
    %c0_i32 = arith.constant 0 : i32
    %c0_i32_0 = arith.constant 0 : i32
    return %arg0, %arg1, %c0_i32 : i32, i32, i32
  }
  func.func @transform_1(%arg0: i32, %arg1: i32) -> (i32, i32, i32) {
    %c0_i32 = arith.constant 0 : i32
    %c0_i32_0 = arith.constant 0 : i32
    return %arg0, %arg1, %c0_i32 : i32, i32, i32
  }
  func.func @transform_2(%arg0: i32, %arg1: i32) -> (i32, i32, i32) {
    %c0_i32 = arith.constant 0 : i32
    %c0_i32_0 = arith.constant 0 : i32
    return %arg0, %arg1, %c0_i32 : i32, i32, i32
  }
  func.func @transform_3(%arg0: i32, %arg1: i32) -> (i32, i32, i32) {
    %c0_i32 = arith.constant 0 : i32
    %c0_i32_0 = arith.constant 0 : i32
    %c0_i32_1 = arith.constant 0 : i32
    %c0_i32_2 = arith.constant 0 : i32
    return %c0_i32, %c0_i32_0, %c0_i32_1 : i32, i32, i32
  }
  func.func @transform_4(%arg0: i32, %arg1: i32) -> (i32, i32, i32) {
    %c0_i32 = arith.constant 0 : i32
    %c0_i32_0 = arith.constant 0 : i32
    %c0_i32_1 = arith.constant 0 : i32
    %c0_i32_2 = arith.constant 0 : i32
    return %c0_i32, %c0_i32_0, %c0_i32_1 : i32, i32, i32
  }
  func.func @transform_5(%arg0: i32, %arg1: i32) -> (i32, i32, i32) {
    %c0_i32 = arith.constant 0 : i32
    %c0_i32_0 = arith.constant 0 : i32
    %c0_i32_1 = arith.constant 0 : i32
    %c0_i32_2 = arith.constant 0 : i32
    return %c0_i32, %c0_i32_0, %c0_i32_1 : i32, i32, i32
  }
  func.func @transform_6(%arg0: i32, %arg1: i32) -> (i32, i32, i32) {
    %c0_i32 = arith.constant 0 : i32
    %c0_i32_0 = arith.constant 0 : i32
    %c0_i32_1 = arith.constant 0 : i32
    %c0_i32_2 = arith.constant 0 : i32
    return %c0_i32, %c0_i32_0, %c0_i32_1 : i32, i32, i32
  }
  func.func @transform_7(%arg0: i32, %arg1: i32) -> (i32, i32, i32) {
    %c0_i32 = arith.constant 0 : i32
    %c0_i32_0 = arith.constant 0 : i32
    %c0_i32_1 = arith.constant 0 : i32
    %c0_i32_2 = arith.constant 0 : i32
    return %c0_i32, %c0_i32_0, %c0_i32_1 : i32, i32, i32
  }
  func.func @transform_8(%arg0: i32, %arg1: i32) -> (i32, i32, i32) {
    %c0_i32 = arith.constant 0 : i32
    %c0_i32_0 = arith.constant 0 : i32
    %c0_i32_1 = arith.constant 0 : i32
    %c0_i32_2 = arith.constant 0 : i32
    return %c0_i32, %c0_i32_0, %c0_i32_1 : i32, i32, i32
  }
  func.func @transform_9(%arg0: i32, %arg1: i32) -> (i32, i32, i32, i32) {
    %c0_i32 = arith.constant 0 : i32
    %c0_i32_0 = arith.constant 0 : i32
    %c0_i32_1 = arith.constant 0 : i32
    return %arg0, %c0_i32, %arg1, %c0_i32_0 : i32, i32, i32, i32
  }
  func.func @transform_10(%arg0: i32, %arg1: i32) -> (i32, i32, i32, i32) {
    %c0_i32 = arith.constant 0 : i32
    %c0_i32_0 = arith.constant 0 : i32
    %c0_i32_1 = arith.constant 0 : i32
    return %arg0, %c0_i32, %arg1, %c0_i32_0 : i32, i32, i32, i32
  }
  func.func @transform_11(%arg0: i32, %arg1: i32) -> (i32, i32, i32, i32) {
    %c0_i32 = arith.constant 0 : i32
    %c0_i32_0 = arith.constant 0 : i32
    %c0_i32_1 = arith.constant 0 : i32
    return %arg0, %c0_i32, %arg1, %c0_i32_0 : i32, i32, i32, i32
  }
}

</mosaic_0001>

<bundles_post_ra>
// kernel: tpu_custom_call.1
= control target key start
LH: loop header
LB: loop body
LE: loop exit
PB: predicated region body
PF: predicated region fallthrough
CT: control target
= control target key end

     0   :  { %s2712_s0 = inlined_call_operand.vmem [shape: f32[2,8,32], index: 0, kind: input, shape index: {}]   ;;  %s2713_s1 = inlined_call_operand.vmem [shape: f32[2,8,32], index: 1, kind: input, shape index: {}]   ;;  %s2714_s2 = inlined_call_operand.vmem [shape: f32[2,8,32], index: 2, kind: input, shape index: {}]   ;;  %s2715_s3 = inlined_call_operand.vmem [shape: f32[4,32,8], index: 3, kind: input, shape index: {}]   ;;  %s2716_s4 = inlined_call_operand.vmem [shape: f32[4,1,8], index: 4, kind: input, shape index: {}]   ;;  %s2717_s5 = inlined_call_operand.vmem [shape: f32[4,32,8], index: 5, kind: input, shape index: {}]   ;;  %s2718_s6 = inlined_call_operand.vmem [shape: f32[4,1,8], index: 6, kind: input, shape index: {}]   ;;  %s2719_s7 = inlined_call_operand.vmem [shape: f32[4,32,8], index: 7, kind: input, shape index: {}]   ;;  %s2720_s8 = inlined_call_operand.vmem [shape: f32[4,1,8], index: 8, kind: input, shape index: {}]   ;;  %s2721_s9 = inlined_call_operand.hbm [shape: f32[2,4,8,8], index: 9, kind: output, shape index: {0}]   ;;  %s2722_s10 = inlined_call_operand.hbm [shape: f32[2,4,8,8], index: 10, kind: output, shape index: {1}]   ;;  %s2723_s11 = inlined_call_operand.hbm [shape: f32[2,4,8,8], index: 11, kind: output, shape index: {2}]  }
   0x1   :  { %2730 = sst [smem:[#allocation9_spill]] %s2712_s0 }
   0x2   :  { %2731 = sst [smem:[#allocation10_spill]] %s2713_s1 }
   0x3   :  { %2732 = sst [smem:[#allocation11_spill]] %s2714_s2 }
   0x4   :  { %2733 = sst [smem:[#allocation12_spill]] %s2715_s3 }
   0x5   :  { %17 = vsyncpa [#allocation3], 0 }
   0x6   :  { %19 = vsyncpa [#allocation3 + $0x1], 0 }
   0x7   :  { %20 = vsyncpa [#allocation5], 0 }
   0x8   :  { %22 = vsyncpa [#allocation5 + $0x1], 0  ;;  %s2223_s17 = smov 0   ;;  %s2225_s18 = smov 0  }
   0x9   :  { %s2227_s19 = smov 0   ;;  %s2229_s20 = smov 0  }
   0xa   :  { %s2231_s21 = smov 0   ;;  %s2233_s22 = smov 0  }
   0xb LB: > { %s2725_s23 = sadd.s32 4294967295, %s2154_s22   ;;  %s2724_s24 = sadd.s32 4294967294, %s2154_s22   ;;  %s2154_s22 = sphi %s2233_s22, %s28_s22   ;;  %s2150_s21 = sphi %s2231_s21, %s2750_s21   ;;  %s2146_s20 = sphi %s2229_s20, %s2749_s20   ;;  %s2142_s19 = sphi %s2227_s19, %s2748_s19   ;;  %s2138_s18 = sphi %s2225_s18, %s2747_s18   ;;  %s2134_s17 = sphi %s2223_s17, %s2746_s17  }
   0xc   : > { %s40_s25 = sadd.s32 1, %s2150_s21  ;;  %s259_s26 = sadd.s32 1, %s2142_s19 }
   0xd   : > { %p42_p0 = scmp.ge.s32.totalorder %s40_s25, 2  ;;  %p269_p1 = scmp.ne.s32.totalorder %s2142_s19, %s2138_s18 }
   0xe   : > { %p270_p2 = scmp.eq.s32.totalorder %s2725_s23, 1  ;;  %p275_p3 = scmp.ne.s32.totalorder %s2138_s18, %s2134_s17 }
   0xf   : > { %s2752_s25 = smov (%p42_p0, %s40_s25), 0  ;;  %p276_p5 = scmp.eq.s32.totalorder %s2724_s24, 1 }
  0x10   : > { %p2265_p4 = por %p270_p2, %p269_p1  ;;  %s254_s28 = ssub.s32 %s2150_s21, %s2752_s25 }
  0x11   : > { %p1716_p6 = scmp.ge.s32.totalorder %s2154_s22, 1  ;;  %p257_p7 = scmp.eq.s32.totalorder %s254_s28, 0 }
  0x12   : > { %p2274_p8 = por %p276_p5, %p275_p3  ;;  %p398_p9 = scmp.lt.s32.totalorder %s2154_s22, 3 }
  0x13   : > { %s2280_s30 = scalar_select %p257_p7, %s2142_s19, %s259_s26  }
  0x14   : > { %p399_p10 = pnand %p1716_p6, %p398_p9 }
  0x15   : > { %s2736_s3 = sld [smem:[#allocation12_spill]] (!%p399_p10)  ;;  %p464_p11 = scmp.lt.s32.totalorder (!%p399_p10), %s2146_s20, 1 }
  0x16   : > { %402 = sbr.rel (%p399_p10) target bundleno = 305 (0x131), region = 56  ;;  %s2737_s0 = sld [smem:[#allocation9_spill]] (!%p399_p10) }
  0x17   : > { %s2738_s1 = sld [smem:[#allocation10_spill]] (!%p399_p10) }
  0x18   : > { %s2739_s2 = sld [smem:[#allocation11_spill]] (!%p399_p10) }
  0x1b   : > { %v489_v0 = vld [vmem:[%s2736_s3 + $0x18] sm:$0xff]  ;;  %v2156_v2 = vmov 0.0   ;;  %v488_v3 = vld [vmem:[%s2736_s3 + $0x10] sm:$0xff]  ;;  %s465_s12 = scalar_select %p464_p11, %s2146_s20, 1  ;;  %v487_v5 = vld [vmem:[%s2736_s3 + $0x8] sm:$0xff]  ;;  %vm530_vm0 = vcmask 261120  }
  0x1c   : > { %v493_v1 = vld [vmem:[%s2736_s3 + $0x38] sm:$0xff]  ;;  %1821 = vmatprep.subr.mxu0 %v2156_v2  ;;  %1832 = vmatprep.subr.mxu1 %v2156_v2  ;;  %v492_v4 = vld [vmem:[%s2736_s3 + $0x30] sm:$0xff]  ;;  %v491_v6 = vld [vmem:[%s2736_s3 + $0x28] sm:$0xff]  ;;  %vm2157_vm1 = vmmov 0   ;;  %vm814_vm2 = vcmask 64512  }
  0x1d   : > { %1822 = vmatpush3.msra.mxu0 %v489_v0  ;;  %1833 = vmatpush3.msra.mxu1 %v493_v1  ;;  %s2306_s16 = sshll.u32 %s465_s12, 3  ;;  %v486_v7 = vld [vmem:[%s2736_s3] sm:$0xff]  ;;  %v497_v10 = vld [vmem:[%s2736_s3 + $0x58] sm:$0xff]  ;;  %v496_v12 = vld [vmem:[%s2736_s3 + $0x50] sm:$0xff]  ;;  %s2158_s12 = smov [#allocation2]  }
  0x1e   : > { %1823 = vmatprep.subr.mxu0 %v2156_v2  ;;  %1834 = vmatprep.subr.mxu1 %v2156_v2  ;;  %s470_s14 = scalar_lea.vmem %s2737_s0, %s2306_s16  ;;  %v490_v8 = vld [vmem:[%s2736_s3 + $0x20] sm:$0xff]  ;;  %v501_v11 = vld [vmem:[%s2736_s3 + $0x78] sm:$0xff]  ;;  %v500_v13 = vld [vmem:[%s2736_s3 + $0x70] sm:$0xff]  ;;  %s477_s23 = scalar_lea.vmem %s2738_s1, %s2306_s16 }
  0x1f   : > { %1824 = vmatpush3.msra.mxu0 %v488_v3  ;;  %1835 = vmatpush3.msra.mxu1 %v492_v4  ;;  %v485_v9 = vld [vmem:[%s470_s14] sm:$0xff]  ;;  %v495_v14 = vld [vmem:[%s2736_s3 + $0x48] sm:$0xff]  ;;  %v823_v18 = vld [vmem:[%s2717_s5 + $0x18] sm:$0xff]  ;;  %s484_s13 = scalar_lea.vmem %s2739_s2, %s2306_s16  ;;  %s447_s14 = sand.u32 1, %s2138_s18  }
  0x20   : > { %1825 = vmatprep.subr.mxu0 %v2156_v2  ;;  %1836 = vmatprep.subr.mxu1 %v2156_v2  ;;  %v499_v15 = vld [vmem:[%s2736_s3 + $0x68] sm:$0xff]  ;;  %v494_v16 = vld [vmem:[%s2736_s3 + $0x40] sm:$0xff]  ;;  %v827_v19 = vld [vmem:[%s2717_s5 + $0x38] sm:$0xff]  ;;  %s2545_s16 = sshll.u32 %s2146_s20, 9  ;;  %s2557_s20 = scalar_lea.sflag [#allocation3], %s447_s14 }
  0x21   : > { %1826 = vmatpush3.msra.mxu0 %v487_v5  ;;  %1837 = vmatpush3.msra.mxu1 %v491_v6  ;;  %v498_v17 = vld [vmem:[%s2736_s3 + $0x60] sm:$0xff]  ;;  %v822_v20 = vld [vmem:[%s2717_s5 + $0x10] sm:$0xff]  ;;  %v821_v22 = vld [vmem:[%s2717_s5 + $0x8] sm:$0xff]  ;;  %s2026_s1 = sshll.u32 %s2158_s12, 4  ;;  %s2027_s1 = int_to_ptr.vmem [resolvable:$false] %s2026_s1 }
  0x22   : > { %1827 = vmatprep.subr.mxu0 %v2156_v2  ;;  %1838 = vmatprep.subr.mxu1 %v2156_v2  ;;  %v826_v21 = vld [vmem:[%s2717_s5 + $0x30] sm:$0xff]  ;;  %v825_v23 = vld [vmem:[%s2717_s5 + $0x28] sm:$0xff]  ;;  %v820_v24 = vld [vmem:[%s2717_s5] sm:$0xff]  ;;  %s2028_s2 = scalar_lea.vmem %s2027_s1, 1024 }
  0x23   : > { %1828 = vmatpush3.msra.mxu0 %v486_v7  ;;  %1829 = vmatprep.mubr.msk.f32.mxu0 %vm2157_vm1, %v2156_v2  ;;  %v824_v25 = vld [vmem:[%s2717_s5 + $0x20] sm:$0xff]  ;;  %v831_v27 = vld [vmem:[%s2717_s5 + $0x58] sm:$0xff]  ;;  %v830_v29 = vld [vmem:[%s2717_s5 + $0x50] sm:$0xff] }
  0x24   : > { %1839 = vmatpush3.msra.mxu1 %v490_v8  ;;  %1840 = vmatprep.mubr.msk.f32.mxu1 %vm2157_vm1, %v2156_v2  ;;  %v819_v26 = vld [vmem:[%s477_s23] sm:$0xff]  ;;  %v835_v28 = vld [vmem:[%s2717_s5 + $0x78] sm:$0xff]  ;;  %v834_v30 = vld [vmem:[%s2717_s5 + $0x70] sm:$0xff]  ;;  %s2527_s23 = sshll.u32 %s447_s14, 5 }
  0x25   : > { %1830 = vmatmul.mubr.msk.f32.vlgmr.msra.gmra.mxu0 %vm530_vm0, %v485_v9  ;;  %1841 = vmatmul.mubr.msk.f32.vlgmr.msra.gmra.mxu1 %vm530_vm0, %v485_v9  ;;  %v829_v31 = vld [vmem:[%s2717_s5 + $0x48] sm:$0xff]  ;;  %v828_v33 = vld [vmem:[%s2717_s5 + $0x40] sm:$0xff]  ;;  %v1155_v35 = vld [vmem:[%s2719_s7 + $0x18] sm:$0xff]  ;;  %s449_s0 = scalar_lea.vmem [#allocation2], %s2527_s23 }
  0x26   : > { %1843 = vmatprep.subr.mxu0 %v2156_v2  ;;  %1854 = vmatprep.subr.mxu1 %v2156_v2  ;;  %v833_v32 = vld [vmem:[%s2717_s5 + $0x68] sm:$0xff]  ;;  %v832_v34 = vld [vmem:[%s2717_s5 + $0x60] sm:$0xff]  ;;  %v1159_v36 = vld [vmem:[%s2719_s7 + $0x38] sm:$0xff]  ;;  %s1508_s26 = sshll.u32 %s449_s0, 4  ;;  %s2547_s26 = int_to_ptr.vmem [resolvable:$true] %s1508_s26 }
  0x27   : > { %1844 = vmatpush3.msra.mxu0 %v497_v10  ;;  %1855 = vmatpush3.msra.mxu1 %v501_v11  ;;  %v1154_v37 = vld [vmem:[%s2719_s7 + $0x10] sm:$0xff]  ;;  %v1153_v39 = vld [vmem:[%s2719_s7 + $0x8] sm:$0xff]  ;;  %v1152_v41 = vld [vmem:[%s2719_s7] sm:$0xff]  ;;  %s2022_s15 = scalar_lea.vmem %s2547_s26, 512  ;;  %p2029_p1 = scmp.lt.s32.totalorder %s2547_s26, %s2027_s1 }
  0x28   : > { %1845 = vmatprep.subr.mxu0 %v2156_v2  ;;  %1856 = vmatprep.subr.mxu1 %v2156_v2  ;;  %v1158_v38 = vld [vmem:[%s2719_s7 + $0x30] sm:$0xff]  ;;  %v1157_v40 = vld [vmem:[%s2719_s7 + $0x28] sm:$0xff]  ;;  %v1156_v42 = vld [vmem:[%s2719_s7 + $0x20] sm:$0xff]  ;;  %p2023_p12 = scmp.ne.s32.totalorder %s2547_s26, %s2022_s15  ;;  %p2030_p2 = scmp.lt.s32.totalorder %s2028_s2, %s2022_s15 }
  0x29   : > { %1846 = vmatpush3.msra.mxu0 %v496_v12  ;;  %1857 = vmatpush3.msra.mxu1 %v500_v13  ;;  %v1151_v43 = vld [vmem:[%s484_s13] sm:$0xff]  ;;  %v1163_v44 = vld [vmem:[%s2719_s7 + $0x58] sm:$0xff]  ;;  %v1162_v46 = vld [vmem:[%s2719_s7 + $0x50] sm:$0xff]  ;;  %s2553_s13 = scalar_lea.hbm %s2721_s9, %s2545_s16 }
  0x2a   : > { %1847 = vmatprep.subr.mxu0 %v2156_v2  ;;  %1858 = vmatprep.subr.mxu1 %v2156_v2  ;;  %v1167_v45 = vld [vmem:[%s2719_s7 + $0x78] sm:$0xff]  ;;  %v1166_v47 = vld [vmem:[%s2719_s7 + $0x70] sm:$0xff]  ;;  %v1161_v48 = vld [vmem:[%s2719_s7 + $0x48] sm:$0xff]  ;;  %p2024_p13 = pnand %p2023_p12, %p2265_p4  ;;  %p2031_p3 = por %p2030_p2, %p2029_p1 }
  0x2b   : > { %1848 = vmatpush3.msra.mxu0 %v495_v14  ;;  %1859 = vmatpush3.msra.mxu1 %v499_v15  ;;  %v1165_v49 = vld [vmem:[%s2719_s7 + $0x68] sm:$0xff]  ;;  %v1160_v50 = vld [vmem:[%s2719_s7 + $0x40] sm:$0xff] }
  0x2c   : > { %1849 = vmatprep.subr.mxu0 %v2156_v2  ;;  %1860 = vmatprep.subr.mxu1 %v2156_v2  ;;  %v1164_v51 = vld [vmem:[%s2719_s7 + $0x60] sm:$0xff]  ;;  %p2025_p0 = pneg %p2024_p13 }
  0x2d   : > { %1850 = vmatpush3.msra.mxu0 %v494_v16  ;;  %1851 = vmatprep.mubr.msk.f32.mxu0 %vm2157_vm1, %v2156_v2  ;;  %v1723_v52 = vld [vmem:[%s2716_s4] ss:$0 sm:$0xff]  ;;  %v1724_v53 = vld [vmem:[%s2716_s4 + $0x1] ss:$0 sm:$0xff]  ;;  %v1725_v60 = vld [vmem:[%s2716_s4 + $0x2] ss:$0 sm:$0xff] }
  0x2e   : > { %1861 = vmatpush3.msra.mxu1 %v498_v17  ;;  %1862 = vmatprep.mubr.msk.f32.mxu1 %vm2157_vm1, %v2156_v2  ;;  %v1726_v61 = vld [vmem:[%s2716_s4 + $0x3] ss:$0 sm:$0xff]  ;;  %p2032_p5 = pnand %p2031_p3, %p2025_p0 }
  0x2f   : > { %1852 = vmatmul.mubr.msk.f32.vlgmr.msra.gmra.mxu0 %vm530_vm0, %v485_v9  ;;  %1863 = vmatmul.mubr.msk.f32.vlgmr.msra.gmra.mxu1 %vm530_vm0, %v485_v9 }
  0x30   : > { %1865 = vmatprep.subr.mxu0 %v2156_v2  ;;  %1876 = vmatprep.subr.mxu1 %v2156_v2 }
  0x31   : > { %1866 = vmatpush3.msra.mxu0 %v823_v18  ;;  %1877 = vmatpush3.msra.mxu1 %v827_v19 }
  0x32   : > { %1867 = vmatprep.subr.mxu0 %v2156_v2  ;;  %1878 = vmatprep.subr.mxu1 %v2156_v2 }
  0x33   : > { %1868 = vmatpush3.msra.mxu0 %v822_v20  ;;  %1879 = vmatpush3.msra.mxu1 %v826_v21 }
  0x34   : > { %1869 = vmatprep.subr.mxu0 %v2156_v2  ;;  %1880 = vmatprep.subr.mxu1 %v2156_v2 }
  0x35   : > { %1870 = vmatpush3.msra.mxu0 %v821_v22  ;;  %1881 = vmatpush3.msra.mxu1 %v825_v23 }
  0x36   : > { %1871 = vmatprep.subr.mxu0 %v2156_v2  ;;  %1882 = vmatprep.subr.mxu1 %v2156_v2 }
  0x37   : > { %1872 = vmatpush3.msra.mxu0 %v820_v24  ;;  %1873 = vmatprep.mubr.msk.f32.mxu0 %vm2157_vm1, %v2156_v2 }
  0x38   : > { %1883 = vmatpush3.msra.mxu1 %v824_v25  ;;  %1884 = vmatprep.mubr.msk.f32.mxu1 %vm2157_vm1, %v2156_v2 }
  0x39   : > { %1874 = vmatmul.mubr.msk.f32.vlgmr.msra.gmra.mxu0 %vm530_vm0, %v819_v26  ;;  %1885 = vmatmul.mubr.msk.f32.vlgmr.msra.gmra.mxu1 %vm530_vm0, %v819_v26 }
  0x3a   : > { %1887 = vmatprep.subr.mxu0 %v2156_v2  ;;  %1898 = vmatprep.subr.mxu1 %v2156_v2 }
  0x3b   : > { %1888 = vmatpush3.msra.mxu0 %v831_v27  ;;  %1899 = vmatpush3.msra.mxu1 %v835_v28 }
  0x3c   : > { %1889 = vmatprep.subr.mxu0 %v2156_v2  ;;  %1900 = vmatprep.subr.mxu1 %v2156_v2 }
  0x3d   : > { %1890 = vmatpush3.msra.mxu0 %v830_v29  ;;  %1901 = vmatpush3.msra.mxu1 %v834_v30 }
  0x3e   : > { %1891 = vmatprep.subr.mxu0 %v2156_v2  ;;  %1902 = vmatprep.subr.mxu1 %v2156_v2 }
  0x3f   : > { %1892 = vmatpush3.msra.mxu0 %v829_v31  ;;  %1903 = vmatpush3.msra.mxu1 %v833_v32 }
  0x40   : > { %1893 = vmatprep.subr.mxu0 %v2156_v2  ;;  %1904 = vmatprep.subr.mxu1 %v2156_v2 }
  0x41   : > { %1894 = vmatpush3.msra.mxu0 %v828_v33  ;;  %1895 = vmatprep.mubr.msk.f32.mxu0 %vm2157_vm1, %v2156_v2 }
  0x42   : > { %1905 = vmatpush3.msra.mxu1 %v832_v34  ;;  %1906 = vmatprep.mubr.msk.f32.mxu1 %vm2157_vm1, %v2156_v2 }
  0x43   : > { %1896 = vmatmul.mubr.msk.f32.vlgmr.msra.gmra.mxu0 %vm530_vm0, %v819_v26  ;;  %1907 = vmatmul.mubr.msk.f32.vlgmr.msra.gmra.mxu1 %vm530_vm0, %v819_v26 }
  0x44   : > { %1909 = vmatprep.subr.mxu0 %v2156_v2  ;;  %1920 = vmatprep.subr.mxu1 %v2156_v2 }
  0x45   : > { %1910 = vmatpush3.msra.mxu0 %v1155_v35  ;;  %1921 = vmatpush3.msra.mxu1 %v1159_v36 }
  0x46   : > { %1911 = vmatprep.subr.mxu0 %v2156_v2  ;;  %1922 = vmatprep.subr.mxu1 %v2156_v2 }
  0x47   : > { %1912 = vmatpush3.msra.mxu0 %v1154_v37  ;;  %1923 = vmatpush3.msra.mxu1 %v1158_v38 }
  0x48   : > { %1913 = vmatprep.subr.mxu0 %v2156_v2  ;;  %1924 = vmatprep.subr.mxu1 %v2156_v2 }
  0x49   : > { %1914 = vmatpush3.msra.mxu0 %v1153_v39  ;;  %1925 = vmatpush3.msra.mxu1 %v1157_v40 }
  0x4a   : > { %1915 = vmatprep.subr.mxu0 %v2156_v2  ;;  %1926 = vmatprep.subr.mxu1 %v2156_v2 }
  0x4b   : > { %1916 = vmatpush3.msra.mxu0 %v1152_v41  ;;  %1917 = vmatprep.mubr.msk.f32.mxu0 %vm2157_vm1, %v2156_v2 }
  0x4c   : > { %1927 = vmatpush3.msra.mxu1 %v1156_v42  ;;  %1928 = vmatprep.mubr.msk.f32.mxu1 %vm2157_vm1, %v2156_v2 }
  0x4d   : > { %1918 = vmatmul.mubr.msk.f32.vlgmr.msra.gmra.mxu0 %vm530_vm0, %v1151_v43  ;;  %1929 = vmatmul.mubr.msk.f32.vlgmr.msra.gmra.mxu1 %vm530_vm0, %v1151_v43 }
  0x4e   : > { %1931 = vmatprep.subr.mxu0 %v2156_v2  ;;  %1942 = vmatprep.subr.mxu1 %v2156_v2 }
  0x4f   : > { %1932 = vmatpush3.msra.mxu0 %v1163_v44  ;;  %1943 = vmatpush3.msra.mxu1 %v1167_v45 }
  0x50   : > { %1933 = vmatprep.subr.mxu0 %v2156_v2  ;;  %1944 = vmatprep.subr.mxu1 %v2156_v2 }
  0x51   : > { %1934 = vmatpush3.msra.mxu0 %v1162_v46  ;;  %1945 = vmatpush3.msra.mxu1 %v1166_v47 }
  0x52   : > { %1935 = vmatprep.subr.mxu0 %v2156_v2  ;;  %1946 = vmatprep.subr.mxu1 %v2156_v2 }
  0x53   : > { %1936 = vmatpush3.msra.mxu0 %v1161_v48  ;;  %1947 = vmatpush3.msra.mxu1 %v1165_v49 }
  0x54   : > { %1937 = vmatprep.subr.mxu0 %v2156_v2  ;;  %1948 = vmatprep.subr.mxu1 %v2156_v2 }
  0x55   : > { %1938 = vmatpush3.msra.mxu0 %v1160_v50  ;;  %1939 = vmatprep.mubr.msk.f32.mxu0 %vm2157_vm1, %v2156_v2 }
  0x56   : > { %1949 = vmatpush3.msra.mxu1 %v1164_v51  ;;  %1950 = vmatprep.mubr.msk.f32.mxu1 %vm2157_vm1, %v2156_v2 }
  0x57   : > { %1940 = vmatmul.mubr.msk.f32.vlgmr.msra.gmra.mxu0 %vm530_vm0, %v1151_v43  ;;  %1951 = vmatmul.mubr.msk.f32.vlgmr.msra.gmra.mxu1 %vm530_vm0, %v1151_v43 }
  0xe5   : > { %v600_v54 = vpop.f32.mrf.mxu0  ;;  %v670_v55 = vpop.f32.mrf.mxu1 }
  0xe6   : > { %v601_v56 = vadd.f32 %v1723_v52, %v600_v54  ;;  %v671_v57 = vadd.f32 %v1724_v53, %v670_v55 }
  0xe7   : > { %v1831_v58 = vpop.f32.mrf.mxu0  ;;  %v1842_v59 = vpop.f32.mrf.mxu1 }
  0xe8   : > { %815 = vst.msk [vmem:[%s449_s0] sm:$0xff] %vm814_vm2, %v601_v56  ;;  %816 = vst.msk [vmem:[%s449_s0 + $0x8] sm:$0xff] %vm814_vm2, %v671_v57 }
  0xef   : > { %v740_v62 = vpop.f32.mrf.mxu0  ;;  %v810_v63 = vpop.f32.mrf.mxu1 }
  0xf0   : > { %v741_v0 = vadd.f32 %v1725_v60, %v740_v62  ;;  %v811_v1 = vadd.f32 %v1726_v61, %v810_v63 }
  0xf1   : > { %v1853_v2 = vpop.f32.mrf.mxu0  ;;  %v1864_v3 = vpop.f32.mrf.mxu1 }
  0xf2   : > { %817 = vst.msk [vmem:[%s449_s0 + $0x10] sm:$0xff] %vm814_vm2, %v741_v0  ;;  %818 = vst.msk [vmem:[%s449_s0 + $0x18] sm:$0xff] %vm814_vm2, %v811_v1 }
  0xf3   : > { %2035 = shalt.err (!%p2032_p5)
}
  0xf4   : > { %s2036_s14 = scalar_lea.hbm %s2553_s13, 512  ;;  %s2040_s28 = scalar_lea.hbm %s2721_s9, 1024 }
  0xf5   : > { %p2037_p6 = scmp.ne.s32.totalorder %s2553_s13, %s2036_s14  ;;  %p2041_p10 = scmp.lt.s32.totalorder %s2553_s13, %s2721_s9 }
  0xf6   : > { %p2042_p11 = scmp.lt.s32.totalorder %s2040_s28, %s2036_s14 }
  0xf7   : > { %p2038_p7 = pnand %p2037_p6, %p2265_p4 }
  0xf8   : > { %p2043_p12 = por %p2042_p11, %p2041_p10 }
  0xf9   : > { %p2039_p9 = pneg %p2038_p7 }
  0xfb   : > { %p2044_p13 = pnand %p2043_p12, %p2039_p9 }
  0xfd   : > { %2047 = shalt.err (!%p2044_p13)
}
  0xfe   : > { %s2726_s1 = smov 128   ;;  %s2728_s2 = smov 8   ;;  %v1731_v4 = vld [vmem:[%s2718_s6] ss:$0 sm:$0xff]  ;;  %v1732_v5 = vld [vmem:[%s2718_s6 + $0x1] ss:$0 sm:$0xff]  ;;  %v933_v6 = vpop.f32.mrf.mxu0  ;;  %v1003_v7 = vpop.f32.mrf.mxu1 }
  0xff   : > { %1953 = dma.vmem_to_hbm [thread:$0]  (%p2265_p4), %s2547_s26, 512, %s2553_s13, %s2557_s20, %s2726_s1, %s2726_s1, %s2728_s2   ;;  %v934_v8 = vadd.f32 %v1731_v4, %v933_v6  ;;  %v1004_v9 = vadd.f32 %v1732_v5, %v1003_v7 }
 0x100   : > { %v1875_v10 = vpop.f32.mrf.mxu0  ;;  %v1886_v11 = vpop.f32.mrf.mxu1  ;;  %s456_s24 = scalar_lea.vmem [#allocation4], %s2527_s23  ;;  %v1733_v12 = vld [vmem:[%s2718_s6 + $0x2] ss:$0 sm:$0xff]  ;;  %v1734_v13 = vld [vmem:[%s2718_s6 + $0x3] ss:$0 sm:$0xff]  ;;  %s2740_s15 = sadd.s32 4294967295, %s2154_s22  }
 0x101   : > { %1147 = vst.msk [vmem:[%s456_s24] sm:$0xff] %vm814_vm2, %v934_v8  ;;  %1148 = vst.msk [vmem:[%s456_s24 + $0x8] sm:$0xff] %vm814_vm2, %v1004_v9  ;;  %s1525_s26 = sshll.u32 %s456_s24, 4  ;;  %s2600_s3 = sand.u32 1, %s2740_s15   ;;  %s2602_s26 = int_to_ptr.vmem [resolvable:$true] %s1525_s26 }
 0x102   : > { %s2608_s13 = scalar_lea.hbm %s2722_s10, %s2545_s16  ;;  %s2048_s28 = scalar_lea.vmem %s2602_s26, 512 }
 0x103   : > { %v1073_v14 = vpop.f32.mrf.mxu0  ;;  %v1143_v15 = vpop.f32.mrf.mxu1  ;;  %p2049_p0 = scmp.ne.s32.totalorder %s2602_s26, %s2048_s28  ;;  %s2161_s12 = smov [#allocation4]  }
 0x104   : > { %v1074_v16 = vadd.f32 %v1733_v12, %v1073_v14  ;;  %v1144_v17 = vadd.f32 %v1734_v13, %v1143_v15  ;;  %s2052_s15 = sshll.u32 %s2161_s12, 4  ;;  %s2053_s15 = int_to_ptr.vmem [resolvable:$false] %s2052_s15 }
 0x105   : > { %v1897_v18 = vpop.f32.mrf.mxu0  ;;  %v1908_v19 = vpop.f32.mrf.mxu1  ;;  %p2050_p1 = pnand %p2049_p0, %p2265_p4  ;;  %s2054_s1 = scalar_lea.vmem %s2053_s15, 1024 }
 0x106   : > { %1149 = vst.msk [vmem:[%s456_s24 + $0x10] sm:$0xff] %vm814_vm2, %v1074_v16  ;;  %1150 = vst.msk [vmem:[%s456_s24 + $0x18] sm:$0xff] %vm814_vm2, %v1144_v17  ;;  %p2055_p3 = scmp.lt.s32.totalorder %s2602_s26, %s2053_s15  ;;  %p2056_p5 = scmp.lt.s32.totalorder %s2054_s1, %s2048_s28 }
 0x107   : > { %p2051_p2 = pneg %p2050_p1 }
 0x108   : > { %p2057_p6 = por %p2056_p5, %p2055_p3 }
 0x10a   : > { %p2058_p7 = pnand %p2057_p6, %p2051_p2 }
 0x10c   : > { %2061 = shalt.err (!%p2058_p7)
}
 0x10d   : > { %s2062_s24 = scalar_lea.hbm %s2608_s13, 512  ;;  %s2066_s12 = scalar_lea.hbm %s2722_s10, 1024 }
 0x10e   : > { %p2063_p9 = scmp.ne.s32.totalorder %s2608_s13, %s2062_s24  ;;  %p2067_p12 = scmp.lt.s32.totalorder %s2608_s13, %s2722_s10 }
 0x10f   : > { %p2068_p13 = scmp.lt.s32.totalorder %s2066_s12, %s2062_s24 }
 0x110   : > { %p2064_p10 = pnand %p2063_p9, %p2265_p4 }
 0x111   : > { %p2069_p0 = por %p2068_p13, %p2067_p12 }
 0x112   : > { %p2065_p11 = pneg %p2064_p10 }
 0x114   : > { %p2070_p1 = pnand %p2069_p0, %p2065_p11 }
 0x116   : > { %2073 = shalt.err (!%p2070_p1)
}
 0x117   : > { %s2741_s1 = smov 8   ;;  %s2742_s28 = smov 128   ;;  %v1739_v20 = vld [vmem:[%s2720_s8] ss:$0 sm:$0xff]  ;;  %v1740_v21 = vld [vmem:[%s2720_s8 + $0x1] ss:$0 sm:$0xff]  ;;  %v1265_v22 = vpop.f32.mrf.mxu0  ;;  %v1335_v23 = vpop.f32.mrf.mxu1 }
 0x118   : > { %s2743_s15 = scalar_lea.sflag [#allocation5], %s2600_s3  ;;  %v1266_v24 = vadd.f32 %v1739_v20, %v1265_v22  ;;  %v1336_v25 = vadd.f32 %v1740_v21, %v1335_v23  ;;  %s463_s24 = scalar_lea.vmem [#allocation6], %s2527_s23  ;;  %v1741_v28 = vld [vmem:[%s2720_s8 + $0x2] ss:$0 sm:$0xff]  ;;  %v1742_v29 = vld [vmem:[%s2720_s8 + $0x3] ss:$0 sm:$0xff] }
 0x119   : > { %1954 = dma.vmem_to_hbm [thread:$0]  (%p2265_p4), %s2602_s26, 512, %s2608_s13, %s2743_s15, %s2742_s28, %s2742_s28, %s2741_s1   ;;  %v1919_v26 = vpop.f32.mrf.mxu0  ;;  %v1930_v27 = vpop.f32.mrf.mxu1 }
 0x11a   : > { %1479 = vst.msk [vmem:[%s463_s24] sm:$0xff] %vm814_vm2, %v1266_v24  ;;  %1480 = vst.msk [vmem:[%s463_s24 + $0x8] sm:$0xff] %vm814_vm2, %v1336_v25  ;;  %s1542_s26 = sshll.u32 %s463_s24, 4  ;;  %s2659_s2 = scalar_lea.hbm %s2723_s11, %s2545_s16  ;;  %s2653_s26 = int_to_ptr.vmem [resolvable:$true] %s1542_s26 }
 0x11b   : > { %v1405_v30 = vpop.f32.mrf.mxu0  ;;  %v1475_v31 = vpop.f32.mrf.mxu1  ;;  %s2074_s20 = scalar_lea.vmem %s2653_s26, 512  ;;  %s2162_s13 = smov [#allocation6]  }
 0x11c   : > { %v1406_v32 = vadd.f32 %v1741_v28, %v1405_v30  ;;  %v1476_v33 = vadd.f32 %v1742_v29, %v1475_v31  ;;  %p2075_p2 = scmp.ne.s32.totalorder %s2653_s26, %s2074_s20  ;;  %s2078_s12 = sshll.u32 %s2162_s13, 4  ;;  %s2079_s12 = int_to_ptr.vmem [resolvable:$false] %s2078_s12 }
 0x11d   : > { %v1941_v34 = vpop.f32.mrf.mxu0  ;;  %v1952_v35 = vpop.f32.mrf.mxu1  ;;  %s2080_s15 = scalar_lea.vmem %s2079_s12, 1024  ;;  %p2081_p6 = scmp.lt.s32.totalorder %s2653_s26, %s2079_s12 }
 0x11e   : > { %1481 = vst.msk [vmem:[%s463_s24 + $0x10] sm:$0xff] %vm814_vm2, %v1406_v32  ;;  %1482 = vst.msk [vmem:[%s463_s24 + $0x18] sm:$0xff] %vm814_vm2, %v1476_v33  ;;  %p2076_p3 = pnand %p2075_p2, %p2265_p4  ;;  %p2082_p7 = scmp.lt.s32.totalorder %s2080_s15, %s2074_s20 }
 0x120   : > { %p2077_p5 = pneg %p2076_p3  ;;  %p2083_p9 = por %p2082_p7, %p2081_p6 }
 0x122   : > { %p2084_p10 = pnand %p2083_p9, %p2077_p5 }
 0x124   : > { %2087 = shalt.err (!%p2084_p10)
}
 0x125   : > { %s2088_s16 = scalar_lea.hbm %s2659_s2, 512  ;;  %s2092_s23 = scalar_lea.hbm %s2723_s11, 1024 }
 0x126   : > { %p2089_p11 = scmp.ne.s32.totalorder %s2659_s2, %s2088_s16  ;;  %p2093_p0 = scmp.lt.s32.totalorder %s2659_s2, %s2723_s11 }
 0x127   : > { %p2094_p1 = scmp.lt.s32.totalorder %s2092_s23, %s2088_s16 }
 0x128   : > { %p2090_p12 = pnand %p2089_p11, %p2265_p4 }
 0x129   : > { %p2095_p2 = por %p2094_p1, %p2093_p0 }
 0x12a   : > { %p2091_p13 = pneg %p2090_p12 }
 0x12c   : > { %p2096_p3 = pnand %p2095_p2, %p2091_p13 }
 0x12e   : > { %2099 = shalt.err (!%p2096_p3)
}
 0x12f   : > { %s2744_s20 = scalar_lea.sflag [#allocation5], %s2600_s3 }
 0x130   : > { %1955 = dma.vmem_to_hbm [thread:$0]  (%p2265_p4), %s2653_s26, 512, %s2659_s2, %s2744_s20, %s2742_s28, %s2742_s28, %s2741_s1  }
 0x131 PF: > { %p1969_p5 = scmp.ge.s32.totalorder %s2154_s22, 2  ;;  %s1557_s12 = sand.u32 1, %s2134_s17  }
 0x132   : > { %s1558_s15 = scalar_lea.sflag [#allocation3], %s1557_s12 }
 0x133   : > { %p1960_p6 = pnand %p1969_p5, %p2274_p8 }
 0x135   : > { %p1961_p7 = pneg %p1960_p6 }
 0x137   : > { %2125 = dma.done.wait (%p1961_p7), %s1558_s15, 512  }
 0x138   : > { %2127 = vsyncadd (%p1961_p7), %s1558_s15, 4294966784  ;;  %s2745_s27 = sadd.s32 4294967294, %s2154_s22  }
 0x139   : > { %s1566_s16 = sand.u32 1, %s2745_s27  }
 0x13a   : > { %s1567_s24 = scalar_lea.sflag [#allocation5], %s1566_s16 }
 0x13b   : > { %2129 = dma.done.wait (%p1961_p7), %s1567_s24, 1024  }
 0x13c   : > { %2131 = vsyncadd (%p1961_p7), %s1567_s24, 4294966272  ;;  %s28_s22 = sadd.s32 1, %s2154_s22   ;;  %s2746_s17 = smov %s2138_s18 }
 0x13d   : > { %p25_p4 = scmp.ge.s32.totalorder %s28_s22, 4   ;;  %s2747_s18 = smov %s2142_s19 }
 0x13e   : > { %s2748_s19 = smov %s2280_s30  ;;  %s2749_s20 = smov %s2150_s21 }
 0x13f   : > { %s2750_s21 = smov %s2752_s25  ;;  %27 = sbr.rel (!%p25_p4) target bundleno = 11 (0xb), region = 129 }
 0x144   :  { %1581 = vsyncpa [#allocation3], 1 }
 0x145   :  { %1583 = vsyncpa [#allocation3 + $0x1], 1 }
 0x146   :  { %1584 = vsyncpa [#allocation5], 1 }
 0x147   :  { %1586 = vsyncpa [#allocation5 + $0x1], 1 }

</bundles_post_ra>
